<compile_context>
chip_gen: v5e
topology: v5e:2x2
jax: 0.10.0
libtpu: 0.0.40
codegen_flags: <defaults>
</compile_context>

<pallas_src>
import functools

import jax
import jax.numpy as jnp
from jax.experimental import pallas as pl
from jax.experimental.pallas import tpu as pltpu

EPS = 1e-8
_TBLK_MAX = 8192     # max time-tile width (lanes); multiple of 128
_NBLK_MAX = 512      # sanity cap on rows per tile


def _round_up(x, m):
    return (x + m - 1) // m * m


def _row_align(dtype):
    # second-minor tiling requirement per dtype (f32: 8, bf16/f16: 16, int8/fp8: 32)
    return {4: 8, 2: 16, 1: 32}.get(jnp.dtype(dtype).itemsize, 8)


def _accumulate(s, e, acc_s, acc_e, acc_ss, acc_ee, acc_se):
    acc_s[...] += jnp.sum(s, axis=-1, keepdims=True)
    acc_e[...] += jnp.sum(e, axis=-1, keepdims=True)
    acc_ss[...] += jnp.sum(s * s, axis=-1, keepdims=True)
    acc_ee[...] += jnp.sum(e * e, axis=-1, keepdims=True)
    acc_se[...] += jnp.sum(s * e, axis=-1, keepdims=True)


def _si_snr_rows_kernel(src_ref, est_ref, out_ref,
                        acc_s, acc_e, acc_ss, acc_ee, acc_se,
                        *, inv_t, t_rem):
    """Accumulate raw sums over the time (lane) axis; finalize per-row SI-SNR.

    src_ref/est_ref: (NBLK, TBLK) native-dtype tiles, time on the lane axis.
    out_ref        : (NBLK, 1) per-row SI-SNR (dB), written on the last time step.
    acc_*          : (NBLK, 1) f32 VMEM accumulators carried across the time axis.
    t_rem          : static; valid lanes of the LAST time tile (0 => tile is full).
    """
    k = pl.program_id(1)
    last = pl.num_programs(1) - 1

    @pl.when(k == 0)
    def _():
        zero = jnp.zeros_like(acc_s)
        acc_s[...] = zero
        acc_e[...] = zero
        acc_ss[...] = zero
        acc_ee[...] = zero
        acc_se[...] = zero

    # Stream native dtype from HBM; upcast per tile, accumulate in f32.
    s = src_ref[...].astype(jnp.float32)
    e = est_ref[...].astype(jnp.float32)

    if t_rem == 0:
        # Time divides the tile width exactly: clean path, no masking anywhere.
        _accumulate(s, e, acc_s, acc_e, acc_ss, acc_ee, acc_se)
    else:
        # Ragged tail handled in-kernel (no wrapper pad copy).  Only the last
        # time tile pays the lane-mask cost; earlier tiles take the clean path.
        @pl.when(k != last)
        def _():
            _accumulate(s, e, acc_s, acc_e, acc_ss, acc_ee, acc_se)

        @pl.when(k == last)
        def _():
            lane = jax.lax.broadcasted_iota(jnp.int32, s.shape, 1)
            m = lane < t_rem
            _accumulate(jnp.where(m, s, 0.0), jnp.where(m, e, 0.0),
                        acc_s, acc_e, acc_ss, acc_ee, acc_se)

    @pl.when(k == last)
    def _():
        sum_s = acc_s[...]
        sum_e = acc_e[...]
        # Zero-mean correction applied algebraically on tiny per-row scalars.
        s_energy = jnp.maximum(acc_ss[...] - sum_s * sum_s * inv_t, 0.0)
        e_energy = jnp.maximum(acc_ee[...] - sum_e * sum_e * inv_t, 0.0)
        dot = acc_se[...] - sum_s * sum_e * inv_t

        ref_energy = s_energy + EPS
        inv_ref = pl.reciprocal(ref_energy, approx=False)      # reused twice
        dot2 = dot * dot
        proj_sq = dot2 * s_energy * inv_ref * inv_ref           # ||proj||^2
        noise_sq = e_energy - 2.0 * dot2 * inv_ref + proj_sq
        noise_sq = jnp.maximum(noise_sq, 0.0)                   # cancellation guard
        ratio = proj_sq * pl.reciprocal(noise_sq + EPS, approx=False)
        out_ref[...] = (10.0 * jnp.log10(ratio + EPS)).astype(out_ref.dtype)


def _tpu_vmem_capacity_bytes():
    try:
        cap = int(pltpu.get_tpu_info().vmem_capacity_bytes)
        return max(cap, 32 * 1024 * 1024)
    except Exception:
        return 64 * 1024 * 1024   # conservative (v7x per-TensorCore)


def _choose_tiles(n_rows, t, max_itemsize, row_align, vmem_cap):
    tblk = min(_round_up(t, 128), _TBLK_MAX)
    # Per-input tile target ~2-4 MiB, derived from physical VMEM so the
    # double-buffered working set stays comfortable on every generation.
    per_tile_target = min(4 * 1024 * 1024,
                          max(1 * 1024 * 1024, (vmem_cap // 3) // 8))
    nblk = per_tile_target // (tblk * max_itemsize)
    nblk = max(row_align, (nblk // row_align) * row_align)
    # Keep >=2 blocks on the parallel row axis (v7x megacore) when rows allow.
    half_rows = _round_up(max((n_rows + 1) // 2, 1), row_align)
    nblk = min(nblk, half_rows)
    nblk = min(nblk, _round_up(n_rows, row_align), _NBLK_MAX)
    return nblk, tblk


def si_snr_per_row(source, estimate_source):
    """source, estimate_source: [..., T] -> per-row SI-SNR (dB), shape (N,)."""
    t = min(source.shape[-1], estimate_source.shape[-1])
    src = source.reshape(-1, source.shape[-1])                 # leading collapse is free
    est = estimate_source.reshape(-1, estimate_source.shape[-1])
    assert src.shape[0] == est.shape[0], "source/estimate row counts differ"
    n = src.shape[0]

    isz_s = jnp.dtype(src.dtype).itemsize
    isz_e = jnp.dtype(est.dtype).itemsize
    row_align = max(_row_align(src.dtype), _row_align(est.dtype))
    vmem_cap = _tpu_vmem_capacity_bytes()
    nblk, tblk = _choose_tiles(n, t, max(isz_s, isz_e), row_align, vmem_cap)

    grid = (pl.cdiv(n, nblk), pl.cdiv(t, tblk))
    # Real working set: 2 pipeline buffers x both input tiles + out/scratch.
    working = 2 * nblk * tblk * (isz_s + isz_e) + 7 * 2 * nblk * 4
    vmem_limit = int(min(vmem_cap, max(4 * 1024 * 1024, 2 * working + (1 << 20))))

    kernel = functools.partial(_si_snr_rows_kernel, inv_t=1.0 / t, t_rem=t % tblk)
    out = pl.pallas_call(
        kernel,
        out_shape=jax.ShapeDtypeStruct((n, 1), jnp.float32),
        grid_spec=pltpu.PrefetchScalarGridSpec(
            num_scalar_prefetch=0,
            grid=grid,
            in_specs=[pl.BlockSpec((nblk, tblk), lambda i, k: (i, k)),
                      pl.BlockSpec((nblk, tblk), lambda i, k: (i, k))],
            out_specs=pl.BlockSpec((nblk, 1), lambda i, k: (i, 0)),
            scratch_shapes=[pltpu.VMEM((nblk, 1), jnp.float32)] * 5),
        compiler_params=pltpu.CompilerParams(
            dimension_semantics=("parallel", "arbitrary"),
            vmem_limit_bytes=vmem_limit),
    )(src, est)
    return out[:, 0]


def si_snr_loss(source, estimate_source, compare_a=None, compare_v=None):
    """JAX/Pallas equivalent of SI_SNR.forward (scalar loss)."""
    del compare_v  # overwritten inside the PyTorch module
    loss = -jnp.mean(si_snr_per_row(source, estimate_source))
    if compare_a is not None:
        # Tiny (B, C) BCE term in plain jnp: a dedicated Pallas launch for a few
        # dozen elements is pure launch/DMA overhead.
        b, c = compare_a.shape
        mix_num = source.shape[0]
        target = jnp.zeros((b, c), jnp.float32).at[:, :mix_num].set(1.0)
        a = compare_a.astype(jnp.float32)
        log_a = jnp.maximum(jnp.log(a), -100.0)          # torch BCELoss log clamp
        log_1a = jnp.maximum(jnp.log(1.0 - a), -100.0)
        loss = loss + jnp.mean(-(target * log_a + (1.0 - target) * log_1a))
    return loss


def _cross_entropy_mean(logits, labels):
    """torch.nn.CrossEntropyLoss (mean reduction, class-index targets)."""
    lg = logits.astype(jnp.float32)
    logz = jax.nn.logsumexp(lg, axis=-1)
    picked = jnp.take_along_axis(lg, labels[:, None].astype(jnp.int32), axis=-1)[:, 0]
    return jnp.mean(logz - picked)


def muse_loss_forward(tgt_wav, pred_wav, tgt_spk, pred_spk):
    """JAX/Pallas equivalent of MuSE_loss.forward."""
    si_snr = si_snr_loss(tgt_wav, pred_wav)
    # Four tiny speaker-CE heads in plain jnp (no kernel launch is worth it for a
    # [B, num_spk] logits matrix; XLA fuses this for free).
    ce = (_cross_entropy_mean(pred_spk[0], tgt_spk)
          + _cross_entropy_mean(pred_spk[1], tgt_spk)
          + _cross_entropy_mean(pred_spk[2], tgt_spk)
          + _cross_entropy_mean(pred_spk[3], tgt_spk))
    return {'si_snr': si_snr, 'ce': ce}


def _si_snr_rows_reference(source, estimate_source):
    """Pure-JAX reference of the per-row SI-SNR (for validation)."""
    t = min(source.shape[-1], estimate_source.shape[-1])
    s = source[..., :t].astype(jnp.float32).reshape(-1, t)
    e = estimate_source[..., :t].astype(jnp.float32).reshape(-1, t)
    s = s - jnp.mean(s, axis=-1, keepdims=True)
    e = e - jnp.mean(e, axis=-1, keepdims=True)
    ref_energy = jnp.sum(s * s, axis=-1, keepdims=True) + EPS
    proj = jnp.sum(s * e, axis=-1, keepdims=True) * s / ref_energy
    noise = e - proj
    ratio = jnp.sum(proj * proj, axis=-1) / (jnp.sum(noise * noise, axis=-1) + EPS)
    return 10.0 * jnp.log10(ratio + EPS)


if __name__ == "__main__":
    key = jax.random.PRNGKey(0)
    k1, k2, k3, k4, k5, k6 = jax.random.split(key, 6)

    # --- Case 1: f32, ragged time length (exercises the in-kernel lane mask) ---
    C, B, T = 2, 4, 1000        # speakers, batch, time  (N = C*B = 8 rows)
    NUM_SPK = 32
    tgt_wav = jax.random.normal(k1, (C, B, T), jnp.float32)
    pred_wav = tgt_wav + 0.1 * jax.random.normal(k2, (C, B, T), jnp.float32)
    tgt_spk = jax.random.randint(k3, (B,), 0, NUM_SPK, dtype=jnp.int32)
    pred_spk = jax.random.normal(k4, (4, B, NUM_SPK), jnp.float32)

    rows_kernel = jax.block_until_ready(si_snr_per_row(tgt_wav, pred_wav))
    rows_ref = jax.block_until_ready(_si_snr_rows_reference(tgt_wav, pred_wav))
    assert rows_kernel.shape == (C * B,)
    assert jnp.allclose(rows_kernel, rows_ref, rtol=1e-3, atol=1e-3), "si-snr mismatch (f32)"

    # --- Case 2: bf16 inputs, multi-tile time reduction, mismatched lengths ---
    C2, B2, T2 = 2, 8, 9000     # N = 16 rows; T spans two 8192-lane tiles
    tgt2 = jax.random.normal(k5, (C2, B2, T2), jnp.float32).astype(jnp.bfloat16)
    pred2 = (tgt2.astype(jnp.float32)
             + 0.1 * jax.random.normal(k6, (C2, B2, T2), jnp.float32)).astype(jnp.bfloat16)
    pred2 = jnp.concatenate(      # estimate slightly longer -> min-length handling
        [pred2, jnp.zeros((C2, B2, 128), jnp.bfloat16)], axis=-1)
    rows2_kernel = jax.block_until_ready(si_snr_per_row(tgt2, pred2))
    rows2_ref = jax.block_until_ready(_si_snr_rows_reference(tgt2, pred2))
    assert rows2_kernel.shape == (C2 * B2,)
    assert jnp.allclose(rows2_kernel, rows2_ref, rtol=5e-3, atol=5e-3), "si-snr mismatch (bf16)"

    # --- Full module forward ---
    out = muse_loss_forward(tgt_wav, pred_wav, tgt_spk, pred_spk)
    jax.block_until_ready(out)
    assert bool(jnp.isfinite(out["si_snr"])) and bool(jnp.isfinite(out["ce"]))
    print("KERNEL_OK")
</pallas_src>

<mosaic_0001>
module attributes {stable_mosaic.version = 11 : i64} {
  func.func @_si_snr_rows_kernel(%arg0: i32, %arg1: i32, %arg2: memref<8x1024xf32, #tpu.memory_space<vmem>>, %arg3: memref<8x1024xf32, #tpu.memory_space<vmem>>, %arg4: memref<8x1xf32, #tpu.memory_space<vmem>>, %arg5: memref<8x1xf32, #tpu.memory_space<vmem>>, %arg6: memref<8x1xf32, #tpu.memory_space<vmem>>, %arg7: memref<8x1xf32, #tpu.memory_space<vmem>>, %arg8: memref<8x1xf32, #tpu.memory_space<vmem>>, %arg9: memref<8x1xf32, #tpu.memory_space<vmem>>) attributes {dimension_semantics = [#tpu.dimension_semantics<parallel>, #tpu.dimension_semantics<arbitrary>], iteration_bounds = array<i64: 1, 1>, scalar_prefetch = 0 : i64, scratch_operands = 5 : i64, tpu.core_type = #tpu.core_type<tc>, window_params = [{transform_indices = @transform_0, window_bounds = array<i64: 8, 1024>}, {transform_indices = @transform_1, window_bounds = array<i64: 8, 1024>}, {transform_indices = @transform_2, window_bounds = array<i64: 8, 1>}]} {
    %c0_i32 = arith.constant 0 : i32
    %0 = arith.cmpi eq, %arg1, %c0_i32 : i32
    %1 = arith.extui %0 : i1 to i32
    %c0_i32_0 = arith.constant 0 : i32
    %2 = arith.cmpi ne, %1, %c0_i32_0 : i32
    scf.if %2 {
      %cst = arith.constant 0.000000e+00 : f32
      %14 = vector.broadcast %cst : f32 to vector<8x1xf32>
      %c0_10 = arith.constant 0 : index
      %c0_11 = arith.constant 0 : index
      %15 = vector.load %arg5[%c0_10, %c0_11] : memref<8x1xf32, #tpu.memory_space<vmem>>, vector<8x1xf32>
      tpu.vector_store %arg5[%c0_10, %c0_11], %14 {strides = array<i32>} : memref<8x1xf32, #tpu.memory_space<vmem>>, vector<8x1xf32>,
      %c0_12 = arith.constant 0 : index
      %c0_13 = arith.constant 0 : index
      %16 = vector.load %arg6[%c0_12, %c0_13] : memref<8x1xf32, #tpu.memory_space<vmem>>, vector<8x1xf32>
      tpu.vector_store %arg6[%c0_12, %c0_13], %14 {strides = array<i32>} : memref<8x1xf32, #tpu.memory_space<vmem>>, vector<8x1xf32>,
      %c0_14 = arith.constant 0 : index
      %c0_15 = arith.constant 0 : index
      %17 = vector.load %arg7[%c0_14, %c0_15] : memref<8x1xf32, #tpu.memory_space<vmem>>, vector<8x1xf32>
      tpu.vector_store %arg7[%c0_14, %c0_15], %14 {strides = array<i32>} : memref<8x1xf32, #tpu.memory_space<vmem>>, vector<8x1xf32>,
      %c0_16 = arith.constant 0 : index
      %c0_17 = arith.constant 0 : index
      %18 = vector.load %arg8[%c0_16, %c0_17] : memref<8x1xf32, #tpu.memory_space<vmem>>, vector<8x1xf32>
      tpu.vector_store %arg8[%c0_16, %c0_17], %14 {strides = array<i32>} : memref<8x1xf32, #tpu.memory_space<vmem>>, vector<8x1xf32>,
      %c0_18 = arith.constant 0 : index
      %c0_19 = arith.constant 0 : index
      %19 = vector.load %arg9[%c0_18, %c0_19] : memref<8x1xf32, #tpu.memory_space<vmem>>, vector<8x1xf32>
      tpu.vector_store %arg9[%c0_18, %c0_19], %14 {strides = array<i32>} : memref<8x1xf32, #tpu.memory_space<vmem>>, vector<8x1xf32>,
    } else {
    }
    %c0 = arith.constant 0 : index
    %c0_1 = arith.constant 0 : index
    %3 = vector.load %arg2[%c0, %c0_1] : memref<8x1024xf32, #tpu.memory_space<vmem>>, vector<8x1024xf32>
    %c0_2 = arith.constant 0 : index
    %c0_3 = arith.constant 0 : index
    %4 = vector.load %arg3[%c0_2, %c0_3] : memref<8x1024xf32, #tpu.memory_space<vmem>>, vector<8x1024xf32>
    %c0_i32_4 = arith.constant 0 : i32
    %5 = arith.cmpi ne, %arg1, %c0_i32_4 : i32
    %6 = arith.extui %5 : i1 to i32
    %c0_i32_5 = arith.constant 0 : i32
    %7 = arith.cmpi ne, %6, %c0_i32_5 : i32
    scf.if %7 {
      %c0_10 = arith.constant 0 : index
      %c0_11 = arith.constant 0 : index
      %14 = vector.load %arg5[%c0_10, %c0_11] : memref<8x1xf32, #tpu.memory_space<vmem>>, vector<8x1xf32>
      %cst = arith.constant dense<0.000000e+00> : vector<8xf32>
      %15 = vector.multi_reduction <add>, %3, %cst [1] : vector<8x1024xf32> to vector<8xf32>
      %16 = vector.shape_cast %15 : vector<8xf32> to vector<8x1xf32>
      %17 = arith.addf %14, %16 : vector<8x1xf32>
      %c0_12 = arith.constant 0 : index
      %c0_13 = arith.constant 0 : index
      %18 = vector.load %arg5[%c0_12, %c0_13] : memref<8x1xf32, #tpu.memory_space<vmem>>, vector<8x1xf32>
      tpu.vector_store %arg5[%c0_12, %c0_13], %17 {strides = array<i32>} : memref<8x1xf32, #tpu.memory_space<vmem>>, vector<8x1xf32>,
      %c0_14 = arith.constant 0 : index
      %c0_15 = arith.constant 0 : index
      %19 = vector.load %arg6[%c0_14, %c0_15] : memref<8x1xf32, #tpu.memory_space<vmem>>, vector<8x1xf32>
      %cst_16 = arith.constant dense<0.000000e+00> : vector<8xf32>
      %20 = vector.multi_reduction <add>, %4, %cst_16 [1] : vector<8x1024xf32> to vector<8xf32>
      %21 = vector.shape_cast %20 : vector<8xf32> to vector<8x1xf32>
      %22 = arith.addf %19, %21 : vector<8x1xf32>
      %c0_17 = arith.constant 0 : index
      %c0_18 = arith.constant 0 : index
      %23 = vector.load %arg6[%c0_17, %c0_18] : memref<8x1xf32, #tpu.memory_space<vmem>>, vector<8x1xf32>
      tpu.vector_store %arg6[%c0_17, %c0_18], %22 {strides = array<i32>} : memref<8x1xf32, #tpu.memory_space<vmem>>, vector<8x1xf32>,
      %c0_19 = arith.constant 0 : index
      %c0_20 = arith.constant 0 : index
      %24 = vector.load %arg7[%c0_19, %c0_20] : memref<8x1xf32, #tpu.memory_space<vmem>>, vector<8x1xf32>
      %25 = arith.mulf %3, %3 : vector<8x1024xf32>
      %cst_21 = arith.constant dense<0.000000e+00> : vector<8xf32>
      %26 = vector.multi_reduction <add>, %25, %cst_21 [1] : vector<8x1024xf32> to vector<8xf32>
      %27 = vector.shape_cast %26 : vector<8xf32> to vector<8x1xf32>
      %28 = arith.addf %24, %27 : vector<8x1xf32>
      %c0_22 = arith.constant 0 : index
      %c0_23 = arith.constant 0 : index
      %29 = vector.load %arg7[%c0_22, %c0_23] : memref<8x1xf32, #tpu.memory_space<vmem>>, vector<8x1xf32>
      tpu.vector_store %arg7[%c0_22, %c0_23], %28 {strides = array<i32>} : memref<8x1xf32, #tpu.memory_space<vmem>>, vector<8x1xf32>,
      %c0_24 = arith.constant 0 : index
      %c0_25 = arith.constant 0 : index
      %30 = vector.load %arg8[%c0_24, %c0_25] : memref<8x1xf32, #tpu.memory_space<vmem>>, vector<8x1xf32>
      %31 = arith.mulf %4, %4 : vector<8x1024xf32>
      %cst_26 = arith.constant dense<0.000000e+00> : vector<8xf32>
      %32 = vector.multi_reduction <add>, %31, %cst_26 [1] : vector<8x1024xf32> to vector<8xf32>
      %33 = vector.shape_cast %32 : vector<8xf32> to vector<8x1xf32>
      %34 = arith.addf %30, %33 : vector<8x1xf32>
      %c0_27 = arith.constant 0 : index
      %c0_28 = arith.constant 0 : index
      %35 = vector.load %arg8[%c0_27, %c0_28] : memref<8x1xf32, #tpu.memory_space<vmem>>, vector<8x1xf32>
      tpu.vector_store %arg8[%c0_27, %c0_28], %34 {strides = array<i32>} : memref<8x1xf32, #tpu.memory_space<vmem>>, vector<8x1xf32>,
      %c0_29 = arith.constant 0 : index
      %c0_30 = arith.constant 0 : index
      %36 = vector.load %arg9[%c0_29, %c0_30] : memref<8x1xf32, #tpu.memory_space<vmem>>, vector<8x1xf32>
      %37 = arith.mulf %3, %4 : vector<8x1024xf32>
      %cst_31 = arith.constant dense<0.000000e+00> : vector<8xf32>
      %38 = vector.multi_reduction <add>, %37, %cst_31 [1] : vector<8x1024xf32> to vector<8xf32>
      %39 = vector.shape_cast %38 : vector<8xf32> to vector<8x1xf32>
      %40 = arith.addf %36, %39 : vector<8x1xf32>
      %c0_32 = arith.constant 0 : index
      %c0_33 = arith.constant 0 : index
      %41 = vector.load %arg9[%c0_32, %c0_33] : memref<8x1xf32, #tpu.memory_space<vmem>>, vector<8x1xf32>
      tpu.vector_store %arg9[%c0_32, %c0_33], %40 {strides = array<i32>} : memref<8x1xf32, #tpu.memory_space<vmem>>, vector<8x1xf32>,
    } else {
    }
    %c0_i32_6 = arith.constant 0 : i32
    %8 = arith.cmpi eq, %arg1, %c0_i32_6 : i32
    %9 = arith.extui %8 : i1 to i32
    %c0_i32_7 = arith.constant 0 : i32
    %10 = arith.cmpi ne, %9, %c0_i32_7 : i32
    scf.if %10 {
      %14 = tpu.iota {dimensions = array<i32: 1>} : vector<8x1024xi32>
      %c1000_i32 = arith.constant 1000 : i32
      %15 = vector.broadcast %c1000_i32 : i32 to vector<8x1024xi32>
      %16 = arith.cmpi slt, %14, %15 : vector<8x1024xi32>
      %cst = arith.constant 0.000000e+00 : f32
      %17 = vector.broadcast %cst : f32 to vector<8x1024xf32>
      %18 = arith.select %16, %3, %17 : vector<8x1024xi1>, vector<8x1024xf32>
      %cst_10 = arith.constant 0.000000e+00 : f32
      %19 = vector.broadcast %cst_10 : f32 to vector<8x1024xf32>
      %20 = arith.select %16, %4, %19 : vector<8x1024xi1>, vector<8x1024xf32>
      %c0_11 = arith.constant 0 : index
      %c0_12 = arith.constant 0 : index
      %21 = vector.load %arg5[%c0_11, %c0_12] : memref<8x1xf32, #tpu.memory_space<vmem>>, vector<8x1xf32>
      %cst_13 = arith.constant dense<0.000000e+00> : vector<8xf32>
      %22 = vector.multi_reduction <add>, %18, %cst_13 [1] : vector<8x1024xf32> to vector<8xf32>
      %23 = vector.shape_cast %22 : vector<8xf32> to vector<8x1xf32>
      %24 = arith.addf %21, %23 : vector<8x1xf32>
      %c0_14 = arith.constant 0 : index
      %c0_15 = arith.constant 0 : index
      %25 = vector.load %arg5[%c0_14, %c0_15] : memref<8x1xf32, #tpu.memory_space<vmem>>, vector<8x1xf32>
      tpu.vector_store %arg5[%c0_14, %c0_15], %24 {strides = array<i32>} : memref<8x1xf32, #tpu.memory_space<vmem>>, vector<8x1xf32>,
      %c0_16 = arith.constant 0 : index
      %c0_17 = arith.constant 0 : index
      %26 = vector.load %arg6[%c0_16, %c0_17] : memref<8x1xf32, #tpu.memory_space<vmem>>, vector<8x1xf32>
      %cst_18 = arith.constant dense<0.000000e+00> : vector<8xf32>
      %27 = vector.multi_reduction <add>, %20, %cst_18 [1] : vector<8x1024xf32> to vector<8xf32>
      %28 = vector.shape_cast %27 : vector<8xf32> to vector<8x1xf32>
      %29 = arith.addf %26, %28 : vector<8x1xf32>
      %c0_19 = arith.constant 0 : index
      %c0_20 = arith.constant 0 : index
      %30 = vector.load %arg6[%c0_19, %c0_20] : memref<8x1xf32, #tpu.memory_space<vmem>>, vector<8x1xf32>
      tpu.vector_store %arg6[%c0_19, %c0_20], %29 {strides = array<i32>} : memref<8x1xf32, #tpu.memory_space<vmem>>, vector<8x1xf32>,
      %c0_21 = arith.constant 0 : index
      %c0_22 = arith.constant 0 : index
      %31 = vector.load %arg7[%c0_21, %c0_22] : memref<8x1xf32, #tpu.memory_space<vmem>>, vector<8x1xf32>
      %32 = arith.mulf %18, %18 : vector<8x1024xf32>
      %cst_23 = arith.constant dense<0.000000e+00> : vector<8xf32>
      %33 = vector.multi_reduction <add>, %32, %cst_23 [1] : vector<8x1024xf32> to vector<8xf32>
      %34 = vector.shape_cast %33 : vector<8xf32> to vector<8x1xf32>
      %35 = arith.addf %31, %34 : vector<8x1xf32>
      %c0_24 = arith.constant 0 : index
      %c0_25 = arith.constant 0 : index
      %36 = vector.load %arg7[%c0_24, %c0_25] : memref<8x1xf32, #tpu.memory_space<vmem>>, vector<8x1xf32>
      tpu.vector_store %arg7[%c0_24, %c0_25], %35 {strides = array<i32>} : memref<8x1xf32, #tpu.memory_space<vmem>>, vector<8x1xf32>,
      %c0_26 = arith.constant 0 : index
      %c0_27 = arith.constant 0 : index
      %37 = vector.load %arg8[%c0_26, %c0_27] : memref<8x1xf32, #tpu.memory_space<vmem>>, vector<8x1xf32>
      %38 = arith.mulf %20, %20 : vector<8x1024xf32>
      %cst_28 = arith.constant dense<0.000000e+00> : vector<8xf32>
      %39 = vector.multi_reduction <add>, %38, %cst_28 [1] : vector<8x1024xf32> to vector<8xf32>
      %40 = vector.shape_cast %39 : vector<8xf32> to vector<8x1xf32>
      %41 = arith.addf %37, %40 : vector<8x1xf32>
      %c0_29 = arith.constant 0 : index
      %c0_30 = arith.constant 0 : index
      %42 = vector.load %arg8[%c0_29, %c0_30] : memref<8x1xf32, #tpu.memory_space<vmem>>, vector<8x1xf32>
      tpu.vector_store %arg8[%c0_29, %c0_30], %41 {strides = array<i32>} : memref<8x1xf32, #tpu.memory_space<vmem>>, vector<8x1xf32>,
      %c0_31 = arith.constant 0 : index
      %c0_32 = arith.constant 0 : index
      %43 = vector.load %arg9[%c0_31, %c0_32] : memref<8x1xf32, #tpu.memory_space<vmem>>, vector<8x1xf32>
      %44 = arith.mulf %18, %20 : vector<8x1024xf32>
      %cst_33 = arith.constant dense<0.000000e+00> : vector<8xf32>
      %45 = vector.multi_reduction <add>, %44, %cst_33 [1] : vector<8x1024xf32> to vector<8xf32>
      %46 = vector.shape_cast %45 : vector<8xf32> to vector<8x1xf32>
      %47 = arith.addf %43, %46 : vector<8x1xf32>
      %c0_34 = arith.constant 0 : index
      %c0_35 = arith.constant 0 : index
      %48 = vector.load %arg9[%c0_34, %c0_35] : memref<8x1xf32, #tpu.memory_space<vmem>>, vector<8x1xf32>
      tpu.vector_store %arg9[%c0_34, %c0_35], %47 {strides = array<i32>} : memref<8x1xf32, #tpu.memory_space<vmem>>, vector<8x1xf32>,
    } else {
    }
    %c0_i32_8 = arith.constant 0 : i32
    %11 = arith.cmpi eq, %arg1, %c0_i32_8 : i32
    %12 = arith.extui %11 : i1 to i32
    %c0_i32_9 = arith.constant 0 : i32
    %13 = arith.cmpi ne, %12, %c0_i32_9 : i32
    scf.if %13 {
      %c0_10 = arith.constant 0 : index
      %c0_11 = arith.constant 0 : index
      %14 = vector.load %arg5[%c0_10, %c0_11] : memref<8x1xf32, #tpu.memory_space<vmem>>, vector<8x1xf32>
      %c0_12 = arith.constant 0 : index
      %c0_13 = arith.constant 0 : index
      %15 = vector.load %arg6[%c0_12, %c0_13] : memref<8x1xf32, #tpu.memory_space<vmem>>, vector<8x1xf32>
      %c0_14 = arith.constant 0 : index
      %c0_15 = arith.constant 0 : index
      %16 = vector.load %arg7[%c0_14, %c0_15] : memref<8x1xf32, #tpu.memory_space<vmem>>, vector<8x1xf32>
      %17 = arith.mulf %14, %14 : vector<8x1xf32>
      %cst = arith.constant 1.000000e-03 : f32
      %18 = vector.broadcast %cst : f32 to vector<8x1xf32>
      %19 = arith.mulf %17, %18 : vector<8x1xf32>
      %20 = arith.subf %16, %19 : vector<8x1xf32>
      %cst_16 = arith.constant 0.000000e+00 : f32
      %21 = vector.broadcast %cst_16 : f32 to vector<8x1xf32>
      %22 = arith.maximumf %20, %21 : vector<8x1xf32>
      %c0_17 = arith.constant 0 : index
      %c0_18 = arith.constant 0 : index
      %23 = vector.load %arg8[%c0_17, %c0_18] : memref<8x1xf32, #tpu.memory_space<vmem>>, vector<8x1xf32>
      %24 = arith.mulf %15, %15 : vector<8x1xf32>
      %cst_19 = arith.constant 1.000000e-03 : f32
      %25 = vector.broadcast %cst_19 : f32 to vector<8x1xf32>
      %26 = arith.mulf %24, %25 : vector<8x1xf32>
      %27 = arith.subf %23, %26 : vector<8x1xf32>
      %cst_20 = arith.constant 0.000000e+00 : f32
      %28 = vector.broadcast %cst_20 : f32 to vector<8x1xf32>
      %29 = arith.maximumf %27, %28 : vector<8x1xf32>
      %c0_21 = arith.constant 0 : index
      %c0_22 = arith.constant 0 : index
      %30 = vector.load %arg9[%c0_21, %c0_22] : memref<8x1xf32, #tpu.memory_space<vmem>>, vector<8x1xf32>
      %31 = arith.mulf %14, %15 : vector<8x1xf32>
      %cst_23 = arith.constant 1.000000e-03 : f32
      %32 = vector.broadcast %cst_23 : f32 to vector<8x1xf32>
      %33 = arith.mulf %31, %32 : vector<8x1xf32>
      %34 = arith.subf %30, %33 : vector<8x1xf32>
      %cst_24 = arith.constant 9.99999993E-9 : f32
      %35 = vector.broadcast %cst_24 : f32 to vector<8x1xf32>
      %36 = arith.addf %22, %35 : vector<8x1xf32>
      %37 = tpu.reciprocal %36 : vector<8x1xf32> -> vector<8x1xf32>
      %38 = arith.mulf %34, %34 : vector<8x1xf32>
      %39 = arith.mulf %38, %22 : vector<8x1xf32>
      %40 = arith.mulf %39, %37 : vector<8x1xf32>
      %41 = arith.mulf %40, %37 : vector<8x1xf32>
      %cst_25 = arith.constant 2.000000e+00 : f32
      %42 = vector.broadcast %cst_25 : f32 to vector<8x1xf32>
      %43 = arith.mulf %42, %38 : vector<8x1xf32>
      %44 = arith.mulf %43, %37 : vector<8x1xf32>
      %45 = arith.subf %29, %44 : vector<8x1xf32>
      %46 = arith.addf %45, %41 : vector<8x1xf32>
      %cst_26 = arith.constant 0.000000e+00 : f32
      %47 = vector.broadcast %cst_26 : f32 to vector<8x1xf32>
      %48 = arith.maximumf %46, %47 : vector<8x1xf32>
      %cst_27 = arith.constant 9.99999993E-9 : f32
      %49 = vector.broadcast %cst_27 : f32 to vector<8x1xf32>
      %50 = arith.addf %48, %49 : vector<8x1xf32>
      %51 = tpu.reciprocal %50 : vector<8x1xf32> -> vector<8x1xf32>
      %52 = arith.mulf %41, %51 : vector<8x1xf32>
      %cst_28 = arith.constant 9.99999993E-9 : f32
      %53 = vector.broadcast %cst_28 : f32 to vector<8x1xf32>
      %54 = arith.addf %52, %53 : vector<8x1xf32>
      %55 = math.log %54 : vector<8x1xf32>
      %cst_29 = arith.constant 0.434294492 : f32
      %56 = vector.broadcast %cst_29 : f32 to vector<8x1xf32>
      %57 = arith.mulf %55, %56 : vector<8x1xf32>
      %cst_30 = arith.constant 1.000000e+01 : f32
      %58 = vector.broadcast %cst_30 : f32 to vector<8x1xf32>
      %59 = arith.mulf %58, %57 : vector<8x1xf32>
      %c0_31 = arith.constant 0 : index
      %c0_32 = arith.constant 0 : index
      %60 = vector.load %arg4[%c0_31, %c0_32] : memref<8x1xf32, #tpu.memory_space<vmem>>, vector<8x1xf32>
      tpu.vector_store %arg4[%c0_31, %c0_32], %59 {strides = array<i32>} : memref<8x1xf32, #tpu.memory_space<vmem>>, vector<8x1xf32>,
    } else {
    }
    return
  }
  func.func @transform_0(%arg0: i32, %arg1: i32) -> (i32, i32) {
    %c0_i32 = arith.constant 0 : i32
    return %arg0, %arg1 : i32, i32
  }
  func.func @transform_1(%arg0: i32, %arg1: i32) -> (i32, i32) {
    %c0_i32 = arith.constant 0 : i32
    return %arg0, %arg1 : i32, i32
  }
  func.func @transform_2(%arg0: i32, %arg1: i32) -> (i32, i32) {
    %c0_i32 = arith.constant 0 : i32
    %c0_i32_0 = arith.constant 0 : i32
    return %arg0, %c0_i32 : i32, i32
  }
}

</mosaic_0001>

<bundles_post_ra>
// kernel: tpu_custom_call.1
= control target key start
LH: loop header
LB: loop body
LE: loop exit
PB: predicated region body
PF: predicated region fallthrough
CT: control target
= control target key end

     0   :  { %7 = vsyncpa [#allocation8], 0  ;;  %s444_s0 = inlined_call_operand.hbm [shape: f32[8,1000], index: 0, kind: input, shape index: {}]   ;;  %s445_s1 = inlined_call_operand.hbm [shape: f32[8,1000], index: 1, kind: input, shape index: {}]   ;;  %s446_s2 = inlined_call_operand.vmem [shape: f32[8,1], index: 2, kind: output, shape index: {}]  }
   0x1   :  { %s14_s11 = sshll.u32 %s444_s0, 4  ;;  %s15_s11 = int_to_ptr.hbm [resolvable:$true] %s14_s11 }
   0x2   :  { %8 = vsyncpa [#allocation10], 0  ;;  %s404_s12 = smov [#allocation7]   ;;  %s25_s16 = sshll.u32 %s445_s1, 4  ;;  %s26_s16 = int_to_ptr.hbm [resolvable:$true] %s25_s16 }
   0x3   :  { %s16_s13 = sshll.u32 %s404_s12, 4  ;;  %s405_s17 = smov [#allocation9]   ;;  %s17_s13 = int_to_ptr.vmem [resolvable:$true] %s16_s13 }
   0x4   :  { %19 = dma.hbm_to_vmem [thread:$0]  %s15_s11, 1024, %s17_s13, [#allocation8]  }
   0x5   :  { %s27_s18 = sshll.u32 %s405_s17, 4  ;;  %s28_s18 = int_to_ptr.vmem [resolvable:$true] %s27_s18 }
   0x6   :  { %30 = dma.hbm_to_vmem [thread:$0]  %s26_s16, 1024, %s28_s18, [#allocation10]  }
   0x7   :  { %400 = dma.done.wait [#allocation8], 1024  }
   0x8   :  { %401 = vsyncadd [#allocation8], 4294966272 }
   0x9   :  { %402 = dma.done.wait [#allocation10], 1024  }
   0xa   :  { %403 = vsyncadd [#allocation10], 4294966272  ;;  %v157_v0 = vlaneseq  ;;  %vm43_vm0 = vcmask 7168   ;;  %v406_v1 = vmov 0.0   ;;  %v57_v3 = vld [vmem:[#allocation9] sm:$0xff]  ;;  %v58_v4 = vld [vmem:[#allocation9 + $0x8] sm:$0xff] }
   0xb   :  { %45 = vst.msk [vmem:[#allocation3] sm:$0xff] %vm43_vm0, %v406_v1  ;;  %v59_v5 = vld [vmem:[#allocation9 + $0x10] sm:$0xff]  ;;  %v204_v7 = vadd.f32 %v58_v4, %v57_v3  ;;  %v60_v8 = vld [vmem:[#allocation9 + $0x18] sm:$0xff]  ;;  %v49_v9 = vld [vmem:[#allocation7] sm:$0xff]  ;;  %v236_v21 = vmul.f32 %v57_v3, %v57_v3  ;;  %v237_v31 = vmul.f32 %v58_v4, %v58_v4 }
   0xc   :  { %44 = vst.msk [vmem:[#allocation2] sm:$0xff] %vm43_vm0, %v406_v1  ;;  %v158_v2 = vand.u32 127, %v157_v0  ;;  %v50_v11 = vld [vmem:[#allocation7 + $0x8] sm:$0xff]  ;;  %v51_v12 = vld [vmem:[#allocation7 + $0x10] sm:$0xff]  ;;  %v256_v13 = vmul.f32 %v57_v3, %v49_v9  ;;  %v61_v14 = vld [vmem:[#allocation9 + $0x20] sm:$0xff]  ;;  %v216_v20 = vmul.f32 %v49_v9, %v49_v9  ;;  %v238_v32 = vmul.f32 %v59_v5, %v59_v5 }
   0xd   :  { %46 = vst.msk [vmem:[#allocation4] sm:$0xff] %vm43_vm0, %v406_v1  ;;  %v205_v10 = vadd.f32 %v204_v7, %v59_v5  ;;  %v191_v15 = vadd.f32 %v50_v11, %v49_v9  ;;  %v257_v16 = vmul.f32 %v58_v4, %v50_v11  ;;  %v258_v17 = vmul.f32 %v59_v5, %v51_v12  ;;  %v52_v19 = vld [vmem:[#allocation7 + $0x18] sm:$0xff]  ;;  %v62_v22 = vld [vmem:[#allocation9 + $0x28] sm:$0xff]  ;;  %v53_v29 = vld [vmem:[#allocation7 + $0x20] sm:$0xff] }
   0xe   :  { %47 = vst.msk [vmem:[#allocation5] sm:$0xff] %vm43_vm0, %v406_v1  ;;  %v165_v6 = vadd.s32 896, %v158_v2  ;;  %v259_v24 = vmul.f32 %v60_v8, %v52_v19  ;;  %v217_v26 = vmul.f32 %v50_v11, %v50_v11  ;;  %v64_v27 = vld [vmem:[#allocation9 + $0x38] sm:$0xff]  ;;  %v218_v30 = vmul.f32 %v51_v12, %v51_v12  ;;  %v63_v33 = vld [vmem:[#allocation9 + $0x30] sm:$0xff]  ;;  %v54_v39 = vld [vmem:[#allocation7 + $0x28] sm:$0xff] }
   0xf   :  { %48 = vst.msk [vmem:[#allocation6] sm:$0xff] %vm43_vm0, %v406_v1  ;;  %v206_v18 = vadd.f32 %v205_v10, %v60_v8  ;;  %v192_v23 = vadd.f32 %v191_v15, %v51_v12  ;;  %v264_v25 = vadd.f32 %v257_v16, %v256_v13  ;;  %v260_v35 = vmul.f32 %v61_v14, %v53_v29  ;;  %v56_v40 = vld [vmem:[#allocation7 + $0x38] sm:$0xff]  ;;  %v55_v49 = vld [vmem:[#allocation7 + $0x30] sm:$0xff] }
  0x10   :  { %vm173_vm1 = vcmp.lt.s32.totalorder %v165_v6, 1000  ;;  %v239_v37 = vmul.f32 %v60_v8, %v60_v8  ;;  %v219_v41 = vmul.f32 %v52_v19, %v52_v19  ;;  %v224_v42 = vadd.f32 %v217_v26, %v216_v20 }
  0x11   :  { %v207_v28 = vadd.f32 %v206_v18, %v61_v14  ;;  %v193_v34 = vadd.f32 %v192_v23, %v52_v19  ;;  %v265_v36 = vadd.f32 %v264_v25, %v258_v17  ;;  %v240_v43 = vmul.f32 %v61_v14, %v61_v14 }
  0x12   :  { %v189_v44 = vsel %vm173_vm1, %v64_v27, 0.0  ;;  %v261_v46 = vmul.f32 %v62_v22, %v54_v39  ;;  %v220_v50 = vmul.f32 %v53_v29, %v53_v29  ;;  %v225_v51 = vadd.f32 %v224_v42, %v218_v30  ;;  %v203_v17 = vld [vmem:[#allocation3] sm:$0xff] }
  0x13   :  { %v208_v38 = vadd.f32 %v207_v28, %v62_v22  ;;  %v194_v45 = vadd.f32 %v193_v34, %v53_v29  ;;  %v266_v47 = vadd.f32 %v265_v36, %v259_v24  ;;  %v244_v52 = vadd.f32 %v237_v31, %v236_v21  ;;  %v190_v20 = vld [vmem:[#allocation2] sm:$0xff] }
  0x14   :  { %v181_v53 = vsel %vm173_vm1, %v56_v40, 0.0  ;;  %v262_v55 = vmul.f32 %v63_v33, %v55_v49  ;;  %v221_v58 = vmul.f32 %v54_v39, %v54_v39  ;;  %v226_v59 = vadd.f32 %v225_v51, %v219_v41  ;;  %v215_v27 = vld [vmem:[#allocation4] sm:$0xff] }
  0x15   :  { %v209_v48 = vadd.f32 %v208_v38, %v63_v33  ;;  %v195_v54 = vadd.f32 %v194_v45, %v54_v39  ;;  %v267_v56 = vadd.f32 %v266_v47, %v260_v35  ;;  %v245_v60 = vadd.f32 %v244_v52, %v238_v32  ;;  %v235_v25 = vld [vmem:[#allocation5] sm:$0xff] }
  0x16   :  { %v241_v63 = vmul.f32 %v62_v22, %v62_v22  ;;  %v263_v0 = vmul.f32 %v189_v44, %v181_v53  ;;  %v222_v1 = vmul.f32 %v55_v49, %v55_v49  ;;  %v227_v2 = vadd.f32 %v226_v59, %v220_v50  ;;  %v255_v23 = vld [vmem:[#allocation6] sm:$0xff] }
  0x17   :  { %v210_v57 = vadd.f32 %v209_v48, %v189_v44  ;;  %v196_v61 = vadd.f32 %v195_v54, %v55_v49  ;;  %v268_v62 = vadd.f32 %v267_v56, %v261_v46  ;;  %v246_v3 = vadd.f32 %v245_v60, %v239_v37 }
  0x18   :  { %v228_v7 = vadd.f32 %v227_v2, %v221_v58  ;;  %v242_v6 = vmul.f32 %v63_v33, %v63_v33  ;;  %v223_v9 = vmul.f32 %v181_v53, %v181_v53  ;;  %v243_v12 = vmul.f32 %v189_v44, %v189_v44 }
  0x19   :  { %211 = vadd.xlane.f32.xlu1 %v210_v57  ;;  %v197_v4 = vadd.f32 %v196_v61, %v181_v53  ;;  %v269_v5 = vadd.f32 %v268_v62, %v262_v55  ;;  %v247_v8 = vadd.f32 %v246_v3, %v240_v43 }
  0x1a   :  { %v229_v11 = vadd.f32 %v228_v7, %v222_v1 }
  0x1b   :  { %198 = vadd.xlane.f32.xlu0 %v197_v4  ;;  %v270_v10 = vadd.f32 %v269_v5, %v263_v0  ;;  %v248_v13 = vadd.f32 %v247_v8, %v241_v63 }
  0x1c   :  { %v230_v15 = vadd.f32 %v229_v11, %v223_v9 }
  0x1d   :  { %v249_v14 = vadd.f32 %v248_v13, %v242_v6 }
  0x1f   :  { %v250_v16 = vadd.f32 %v249_v14, %v243_v12 }
  0x21   :  { %271 = vadd.xlane.f32.xlu1 %v270_v10  ;;  %251 = vadd.xlane.f32.xlu2 %v250_v16 }
  0x23   :  { %231 = vadd.xlane.f32.xlu0 %v230_v15 }
  0x8c   :  { %v212_v18 = vpop.xlane.xlu1 %211 }
  0x8d   :  { %v213_v19 = vadd.f32 %v212_v18, %v203_v17 }
  0x8e   :  { %v199_v21 = vpop.xlane.xlu0 %198 }
  0x8f   :  { %214 = vst.msk [vmem:[#allocation3] sm:$0xff] %vm43_vm0, %v213_v19  ;;  %v200_v22 = vadd.f32 %v199_v21, %v190_v20 }
  0x91   :  { %202 = vst.msk [vmem:[#allocation2] sm:$0xff] %vm43_vm0, %v200_v22 }
  0x94   :  { %v272_v24 = vpop.xlane.xlu1 %271  ;;  %v252_v28 = vpop.xlane.xlu2 %251 }
  0x95   :  { %v273_v26 = vadd.f32 %v272_v24, %v255_v23  ;;  %v253_v30 = vadd.f32 %v252_v28, %v235_v25 }
  0x96   :  { %v232_v29 = vpop.xlane.xlu0 %231  ;;  %v276_v38 = vld [vmem:[#allocation3] sm:$0xff] }
  0x97   :  { %274 = vst.msk [vmem:[#allocation6] sm:$0xff] %vm43_vm0, %v273_v26  ;;  %v233_v31 = vadd.f32 %v232_v29, %v215_v27  ;;  %v283_v42 = vmul.f32 %v276_v38, %v276_v38 }
  0x98   :  { %v275_v32 = vld [vmem:[#allocation2] sm:$0xff]  ;;  %254 = vst.msk [vmem:[#allocation5] sm:$0xff] %vm43_vm0, %v253_v30 }
  0x99   :  { %234 = vst.msk [vmem:[#allocation4] sm:$0xff] %vm43_vm0, %v233_v31  ;;  %v278_v33 = vmul.f32 %v275_v32, %v275_v32  ;;  %v288_v40 = vmul.f32 %v276_v38, %v275_v32  ;;  %v284_v47 = vmul.f32 0.001, %v283_v42 }
  0x9b   :  { %v279_v34 = vmul.f32 0.001, %v278_v33  ;;  %v289_v43 = vmul.f32 0.001, %v288_v40 }
  0x9e   :  { %v287_v41 = vld [vmem:[#allocation6] sm:$0xff] }
  0x9f   :  { %v290_v45 = vsub.f32 %v287_v41, %v289_v43  ;;  %v282_v50 = vld [vmem:[#allocation5] sm:$0xff] }
  0xa0   :  { %v277_v35 = vld [vmem:[#allocation4] sm:$0xff]  ;;  %v285_v55 = vsub.f32 %v282_v50, %v284_v47 }
  0xa1   :  { %v280_v36 = vsub.f32 %v277_v35, %v279_v34  ;;  %v306_v51 = vmul.f32 %v290_v45, %v290_v45 }
  0xa2   :  { %v286_v62 = vmax.f32 %v285_v55, 0.0 }
  0xa3   :  { %v281_v37 = vmax.f32 %v280_v36, 0.0  ;;  %v310_v57 = vmul.f32 2.0, %v306_v51 }
  0xa5   :  { %v291_v39 = vadd.f32 1e-08, %v281_v37  ;;  %v307_v59 = vmul.f32 %v306_v51, %v281_v37 }
  0xa7   :  { %346 = vrcp.f32 %v291_v39  ;;  %v303_v49 = vand.u32 2147483648, %v291_v39  ;;  %v301_v53 = vand.u32 2147483647, %v291_v39  ;;  %vm297_vm3 = vweird.f32 %v291_v39 }
  0xa9   :  { %v304_v56 = vor.u32 1.1754944e-38, %v303_v49  ;;  %vm302_vm5 = vcmp.eq.f32.partialorder %v301_v53, 8.507059e+37 }
  0xad   :  { %v347_v44 = vpop.eup %346 }
  0xae   :  { %v293_v46 = vmul.f32 %v347_v44, %v291_v39  ;;  %vm298_vm2 = vweird.f32 %v347_v44 }
  0xaf   :  { %vm299_vm4 = vmor %vm297_vm3, %vm298_vm2 }
  0xb0   :  { %v294_v48 = vsub.f32 1.0, %v293_v46 }
  0xb2   :  { %v295_v52 = vmul.f32 %v347_v44, %v294_v48 }
  0xb4   :  { %v296_v54 = vadd.f32 %v347_v44, %v295_v52 }
  0xb6   :  { %v300_v58 = vsel %vm299_vm4, %v347_v44, %v296_v54 }
  0xb7   :  { %v305_v60 = vsel %vm302_vm5, %v304_v56, %v300_v58 }
  0xb8   :  { %v308_v61 = vmul.f32 %v307_v59, %v305_v60  ;;  %v311_v63 = vmul.f32 %v310_v57, %v305_v60 }
  0xba   :  { %v309_v0 = vmul.f32 %v308_v61, %v305_v60  ;;  %v312_v1 = vsub.f32 %v286_v62, %v311_v63 }
  0xbc   :  { %v313_v2 = vadd.f32 %v312_v1, %v309_v0 }
  0xbe   :  { %v314_v3 = vmax.f32 %v313_v2, 0.0 }
  0xc0   :  { %v315_v4 = vadd.f32 1e-08, %v314_v3 }
  0xc2   :  { %348 = vrcp.f32 %v315_v4  ;;  %v327_v8 = vand.u32 2147483648, %v315_v4  ;;  %v325_v10 = vand.u32 2147483647, %v315_v4  ;;  %vm321_vm7 = vweird.f32 %v315_v4 }
  0xc4   :  { %v328_v12 = vor.u32 1.1754944e-38, %v327_v8  ;;  %vm326_vm9 = vcmp.eq.f32.partialorder %v325_v10, 8.507059e+37 }
  0xc8   :  { %v349_v5 = vpop.eup %348 }
  0xc9   :  { %v317_v7 = vmul.f32 %v349_v5, %v315_v4  ;;  %vm322_vm6 = vweird.f32 %v349_v5 }
  0xca   :  { %vm323_vm8 = vmor %vm321_vm7, %vm322_vm6 }
  0xcb   :  { %v318_v6 = vsub.f32 1.0, %v317_v7 }
  0xcd   :  { %v319_v9 = vmul.f32 %v349_v5, %v318_v6 }
  0xcf   :  { %v320_v11 = vadd.f32 %v349_v5, %v319_v9 }
  0xd1   :  { %v324_v13 = vsel %vm323_vm8, %v349_v5, %v320_v11 }
  0xd2   :  { %v329_v14 = vsel %vm326_vm9, %v328_v12, %v324_v13 }
  0xd3   :  { %v330_v15 = vmul.f32 %v329_v14, %v309_v0 }
  0xd5   :  { %v331_v16 = vadd.f32 1e-08, %v330_v15 }
  0xd7   :  { %350 = vlog2.f32 %v331_v16 }
  0xdd   :  { %v351_v17 = vpop.eup %350 }
  0xde   :  { %v333_v18 = vmul.f32 0.6931472, %v351_v17 }
  0xe0   :  { %v334_v19 = vmul.f32 0.4342945, %v333_v18 }
  0xe2   :  { %v335_v20 = vmul.f32 10.0, %v334_v19 }
  0xe4   :  { %336 = vst.msk [vmem:[%s446_s2] sm:$0xff] %vm43_vm0, %v335_v20 }
  0xe5   :  { %341 = vsyncpa [#allocation8], 1 }
  0xe6   :  { %342 = vsyncpa [#allocation10], 1 }

</bundles_post_ra>
